<compile_context>
chip_gen: v6e
topology: v6e:2x2x1
jax: 0.10.0
libtpu: 0.0.40
codegen_flags: <defaults>
</compile_context>

<pallas_src>
import jax
import jax.numpy as jnp
from jax.experimental import pallas as pl
from jax.experimental.pallas import tpu as pltpu


# ----------------------------- kernel helpers -------------------------------

def _mish(x):
    # mish(x) = x * tanh(softplus(x)) = x * (u^2 + 2u) / (u^2 + 2u + 2), u = e^x.
    # Clamp the exp argument so u^2 stays finite in f32; for x >= 20 the gate
    # is already 1.0 to f32 precision so the result is exact.
    u = jnp.exp(jnp.minimum(x, 20.0))
    num = u * (u + 2.0)
    return x * num * pl.reciprocal(num + 2.0, approx=True)


def _layernorm(x, gamma, beta, eps=1e-5):
    mu = jnp.mean(x, axis=-1, keepdims=True)
    var = jnp.mean((x - mu) * (x - mu), axis=-1, keepdims=True)
    return (x - mu) * jax.lax.rsqrt(var + eps) * gamma + beta


# ----------------------------- fused kernel ---------------------------------

def _segment_vgae_kernel(
    cls_ref, lg_ref,
    # classify_seg_emb params
    w1c_ref, b1c_ref, g1c_ref, be1c_ref, w2c_ref, b2c_ref,
    # mu_encoder params (layer-1 weight pre-split: local_global rows / cls rows)
    w1m_lg_ref, w1m_cl_ref, b1m_ref, g1m_ref, be1m_ref, w2m_ref, b2m_ref,
    # logstd_encoder params (same layout as mu_encoder)
    w1s_lg_ref, w1s_cl_ref, b1s_ref, g1s_ref, be1s_ref, w2s_ref, b2s_ref,
    mu_ref, logstd_ref):

    cls = cls_ref[...].astype(jnp.float32)
    lg = lg_ref[...].astype(jnp.float32)

    # --- classify_seg_emb: Linear -> LayerNorm -> Mish -> (Dropout=id) -> Linear
    h = jnp.dot(cls, w1c_ref[...], preferred_element_type=jnp.float32) + b1c_ref[...]
    h = _mish(_layernorm(h, g1c_ref[...], be1c_ref[...]))
    cls_seg = jnp.dot(h, w2c_ref[...], preferred_element_type=jnp.float32) + b2c_ref[...]

    # --- seg_feat = concat([lg, cls_seg], axis=1) is fused into the encoders'
    #     first matmul via the row-split weights (no in-kernel lane concat).
    def encoder(w1_lg_r, w1_cl_r, b1_r, g1_r, be1_r, w2_r, b2_r):
        h = (jnp.dot(lg, w1_lg_r[...], preferred_element_type=jnp.float32)
             + jnp.dot(cls_seg, w1_cl_r[...], preferred_element_type=jnp.float32)
             + b1_r[...])
        h = _mish(_layernorm(h, g1_r[...], be1_r[...]))
        return jnp.dot(h, w2_r[...], preferred_element_type=jnp.float32) + b2_r[...]

    mu_ref[...] = encoder(w1m_lg_ref, w1m_cl_ref, b1m_ref, g1m_ref, be1m_ref,
                          w2m_ref, b2m_ref).astype(mu_ref.dtype)
    logstd_ref[...] = encoder(w1s_lg_ref, w1s_cl_ref, b1s_ref, g1s_ref, be1s_ref,
                              w2s_ref, b2s_ref).astype(logstd_ref.dtype)


# ----------------------------- wrapper ---------------------------------------

def _round_up(x, m):
    return (x + m - 1) // m * m


def segment_vgae_forward(local_global_feat, classify_emb, params, *, tm=1024):
    """Fused Segment_VGAE forward. Returns (mu, logstd)."""
    n, f_dim = local_global_feat.shape
    n2, c_dim = classify_emb.shape
    assert n == n2, "node counts must match"
    e_dim = params["mu"]["w2"].shape[1]

    # Large row tile to amortize per-step overhead; shrink for tiny inputs.
    tm = min(tm, _round_up(max(n, 1), 8))
    n_pad = _round_up(n, tm)
    if n_pad != n:
        pad = n_pad - n
        local_global_feat = jnp.pad(local_global_feat, ((0, pad), (0, 0)))
        classify_emb = jnp.pad(classify_emb, ((0, pad), (0, 0)))

    p_c, p_m, p_s = params["cls"], params["mu"], params["logstd"]
    flat_params = [
        p_c["w1"], p_c["b1"], p_c["g1"], p_c["be1"], p_c["w2"], p_c["b2"],
        p_m["w1_lg"], p_m["w1_cl"], p_m["b1"], p_m["g1"], p_m["be1"],
        p_m["w2"], p_m["b2"],
        p_s["w1_lg"], p_s["w1_cl"], p_s["b1"], p_s["g1"], p_s["be1"],
        p_s["w2"], p_s["b2"],
    ]

    # Full-array spec with a constant index map: fetched into VMEM once and
    # kept resident across all row tiles.
    full = lambda a: pl.BlockSpec(a.shape, lambda i: (0,) * a.ndim)

    grid_spec = pltpu.PrefetchScalarGridSpec(
        num_scalar_prefetch=0,
        grid=(pl.cdiv(n_pad, tm),),
        in_specs=[
            pl.BlockSpec((tm, c_dim), lambda i: (i, 0)),   # classify_emb tile
            pl.BlockSpec((tm, f_dim), lambda i: (i, 0)),   # local_global tile
        ] + [full(a) for a in flat_params],
        out_specs=[
            pl.BlockSpec((tm, e_dim), lambda i: (i, 0)),   # mu tile
            pl.BlockSpec((tm, e_dim), lambda i: (i, 0)),   # logstd tile
        ],
    )

    mu, logstd = pl.pallas_call(
        _segment_vgae_kernel,
        out_shape=(jax.ShapeDtypeStruct((n_pad, e_dim), jnp.float32),
                   jax.ShapeDtypeStruct((n_pad, e_dim), jnp.float32)),
        grid_spec=grid_spec,
        compiler_params=pltpu.CompilerParams(
            dimension_semantics=("parallel",)),
    )(classify_emb, local_global_feat, *flat_params)

    if n_pad != n:
        mu = mu[:n]
        logstd = logstd[:n]
    return mu, logstd


# ----------------------------- parameter init -------------------------------

def _init_linear(key, fan_in, fan_out):
    bound = 1.0 / (float(fan_in) ** 0.5)
    kw, kb = jax.random.split(key)
    w = jax.random.uniform(kw, (fan_in, fan_out), jnp.float32, -bound, bound)
    b = jax.random.uniform(kb, (1, fan_out), jnp.float32, -bound, bound)
    return w, b


def _init_mlp2(key, in_ch, hid_ch, out_ch):
    """2-layer MLP: Linear -> LayerNorm -> Mish -> Dropout -> Linear."""
    k1, k2 = jax.random.split(key)
    w1, b1 = _init_linear(k1, in_ch, hid_ch)
    w2, b2 = _init_linear(k2, hid_ch, out_ch)
    return dict(w1=w1, b1=b1,
                g1=jnp.ones((1, hid_ch), jnp.float32),
                be1=jnp.zeros((1, hid_ch), jnp.float32),
                w2=w2, b2=b2)


class SegmentVGAE:
    def __init__(self, key, classify_hidden_dim, final_out_emb, segment_emb_dim):
        k1, k2, k3 = jax.random.split(key, 3)
        input_dim = classify_hidden_dim + final_out_emb
        cls_mlp = _init_mlp2(k1, classify_hidden_dim,
                             classify_hidden_dim * 2, classify_hidden_dim)
        mu_mlp = _init_mlp2(k2, input_dim, input_dim * 2, segment_emb_dim)
        ls_mlp = _init_mlp2(k3, input_dim, input_dim * 2, segment_emb_dim)

        def split_encoder(p):
            # concat order is [local_global_feat, cls_seg_emb]
            return dict(w1_lg=p["w1"][:final_out_emb],
                        w1_cl=p["w1"][final_out_emb:],
                        b1=p["b1"], g1=p["g1"], be1=p["be1"],
                        w2=p["w2"], b2=p["b2"])

        self.params = dict(cls=cls_mlp,
                           mu=split_encoder(mu_mlp),
                           logstd=split_encoder(ls_mlp))

    def __call__(self, local_global_feat, classify_emb, *, tm=1024):
        return segment_vgae_forward(local_global_feat, classify_emb,
                                    self.params, tm=tm)


# ----------------------------- pure-JAX reference ----------------------------

def _reference_forward(lg, cls, params):
    def mish(x):
        return x * jnp.tanh(jnp.logaddexp(x, 0.0))

    def ln(x, g, b, eps=1e-5):
        m = jnp.mean(x, -1, keepdims=True)
        v = jnp.mean((x - m) ** 2, -1, keepdims=True)
        return (x - m) * jax.lax.rsqrt(v + eps) * g + b

    p = params["cls"]
    h = cls @ p["w1"] + p["b1"]
    cls_seg = mish(ln(h, p["g1"], p["be1"])) @ p["w2"] + p["b2"]

    def enc(p):
        h = lg @ p["w1_lg"] + cls_seg @ p["w1_cl"] + p["b1"]
        return mish(ln(h, p["g1"], p["be1"])) @ p["w2"] + p["b2"]

    return enc(params["mu"]), enc(params["logstd"])


# ----------------------------- demo / smoke test ----------------------------

if __name__ == "__main__":
    classify_hidden_dim = 16
    final_out_emb = 32
    segment_emb_dim = 16
    n_nodes = 8

    root = jax.random.PRNGKey(0)
    k_params, k_lg, k_cls = jax.random.split(root, 3)

    model = SegmentVGAE(k_params, classify_hidden_dim, final_out_emb,
                        segment_emb_dim)

    local_global_feat = jax.random.normal(
        k_lg, (n_nodes, final_out_emb), jnp.float32)
    classify_emb = jax.random.normal(
        k_cls, (n_nodes, classify_hidden_dim), jnp.float32)

    mu, logstd = model(local_global_feat, classify_emb)
    mu, logstd = jax.block_until_ready((mu, logstd))

    assert mu.shape == (n_nodes, segment_emb_dim)
    assert logstd.shape == (n_nodes, segment_emb_dim)
    assert bool(jnp.all(jnp.isfinite(mu))) and bool(jnp.all(jnp.isfinite(logstd)))

    # correctness vs. pure-JAX reference (loose tol: Mish uses approx reciprocal)
    mu_ref, logstd_ref = _reference_forward(local_global_feat, classify_emb,
                                            model.params)
    scale = float(jnp.maximum(jnp.max(jnp.abs(mu_ref)), 1.0))
    assert float(jnp.max(jnp.abs(mu - mu_ref))) <= 5e-2 * scale
    scale = float(jnp.maximum(jnp.max(jnp.abs(logstd_ref)), 1.0))
    assert float(jnp.max(jnp.abs(logstd - logstd_ref))) <= 5e-2 * scale

    # also exercise the multi-tile path with a larger, non-aligned node count
    n_big = 1000
    k_lg2, k_cls2 = jax.random.split(jax.random.PRNGKey(1))
    lg_big = jax.random.normal(k_lg2, (n_big, final_out_emb), jnp.float32)
    cls_big = jax.random.normal(k_cls2, (n_big, classify_hidden_dim), jnp.float32)
    mu_b, ls_b = jax.block_until_ready(model(lg_big, cls_big, tm=512))
    mu_br, ls_br = _reference_forward(lg_big, cls_big, model.params)
    assert mu_b.shape == (n_big, segment_emb_dim)
    scale = float(jnp.maximum(jnp.max(jnp.abs(mu_br)), 1.0))
    assert float(jnp.max(jnp.abs(mu_b - mu_br))) <= 5e-2 * scale
    scale = float(jnp.maximum(jnp.max(jnp.abs(ls_br)), 1.0))
    assert float(jnp.max(jnp.abs(ls_b - ls_br))) <= 5e-2 * scale

    print("KERNEL_OK")
</pallas_src>

<mosaic_0001>
module attributes {stable_mosaic.version = 11 : i64} {
  func.func @_segment_vgae_kernel(%arg0: i32, %arg1: memref<8x16xf32, #tpu.memory_space<vmem>>, %arg2: memref<8x32xf32, #tpu.memory_space<vmem>>, %arg3: memref<16x32xf32, #tpu.memory_space<vmem>>, %arg4: memref<1x32xf32, #tpu.memory_space<vmem>>, %arg5: memref<1x32xf32, #tpu.memory_space<vmem>>, %arg6: memref<1x32xf32, #tpu.memory_space<vmem>>, %arg7: memref<32x16xf32, #tpu.memory_space<vmem>>, %arg8: memref<1x16xf32, #tpu.memory_space<vmem>>, %arg9: memref<32x96xf32, #tpu.memory_space<vmem>>, %arg10: memref<16x96xf32, #tpu.memory_space<vmem>>, %arg11: memref<1x96xf32, #tpu.memory_space<vmem>>, %arg12: memref<1x96xf32, #tpu.memory_space<vmem>>, %arg13: memref<1x96xf32, #tpu.memory_space<vmem>>, %arg14: memref<96x16xf32, #tpu.memory_space<vmem>>, %arg15: memref<1x16xf32, #tpu.memory_space<vmem>>, %arg16: memref<32x96xf32, #tpu.memory_space<vmem>>, %arg17: memref<16x96xf32, #tpu.memory_space<vmem>>, %arg18: memref<1x96xf32, #tpu.memory_space<vmem>>, %arg19: memref<1x96xf32, #tpu.memory_space<vmem>>, %arg20: memref<1x96xf32, #tpu.memory_space<vmem>>, %arg21: memref<96x16xf32, #tpu.memory_space<vmem>>, %arg22: memref<1x16xf32, #tpu.memory_space<vmem>>, %arg23: memref<8x16xf32, #tpu.memory_space<vmem>>, %arg24: memref<8x16xf32, #tpu.memory_space<vmem>>) attributes {dimension_semantics = [#tpu.dimension_semantics<parallel>], iteration_bounds = array<i64: 1>, scalar_prefetch = 0 : i64, scratch_operands = 0 : i64, tpu.core_type = #tpu.core_type<tc>, window_params = [{transform_indices = @transform_0, window_bounds = array<i64: 8, 16>}, {transform_indices = @transform_1, window_bounds = array<i64: 8, 32>}, {pipeline_mode = #tpu.pipeline_mode<synchronous>, transform_indices = @transform_2, window_bounds = array<i64: 16, 32>}, {pipeline_mode = #tpu.pipeline_mode<synchronous>, transform_indices = @transform_3, window_bounds = array<i64: 1, 32>}, {pipeline_mode = #tpu.pipeline_mode<synchronous>, transform_indices = @transform_4, window_bounds = array<i64: 1, 32>}, {pipeline_mode = #tpu.pipeline_mode<synchronous>, transform_indices = @transform_5, window_bounds = array<i64: 1, 32>}, {pipeline_mode = #tpu.pipeline_mode<synchronous>, transform_indices = @transform_6, window_bounds = array<i64: 32, 16>}, {pipeline_mode = #tpu.pipeline_mode<synchronous>, transform_indices = @transform_7, window_bounds = array<i64: 1, 16>}, {pipeline_mode = #tpu.pipeline_mode<synchronous>, transform_indices = @transform_8, window_bounds = array<i64: 32, 96>}, {pipeline_mode = #tpu.pipeline_mode<synchronous>, transform_indices = @transform_9, window_bounds = array<i64: 16, 96>}, {pipeline_mode = #tpu.pipeline_mode<synchronous>, transform_indices = @transform_10, window_bounds = array<i64: 1, 96>}, {pipeline_mode = #tpu.pipeline_mode<synchronous>, transform_indices = @transform_11, window_bounds = array<i64: 1, 96>}, {pipeline_mode = #tpu.pipeline_mode<synchronous>, transform_indices = @transform_12, window_bounds = array<i64: 1, 96>}, {pipeline_mode = #tpu.pipeline_mode<synchronous>, transform_indices = @transform_13, window_bounds = array<i64: 96, 16>}, {pipeline_mode = #tpu.pipeline_mode<synchronous>, transform_indices = @transform_14, window_bounds = array<i64: 1, 16>}, {pipeline_mode = #tpu.pipeline_mode<synchronous>, transform_indices = @transform_15, window_bounds = array<i64: 32, 96>}, {pipeline_mode = #tpu.pipeline_mode<synchronous>, transform_indices = @transform_16, window_bounds = array<i64: 16, 96>}, {pipeline_mode = #tpu.pipeline_mode<synchronous>, transform_indices = @transform_17, window_bounds = array<i64: 1, 96>}, {pipeline_mode = #tpu.pipeline_mode<synchronous>, transform_indices = @transform_18, window_bounds = array<i64: 1, 96>}, {pipeline_mode = #tpu.pipeline_mode<synchronous>, transform_indices = @transform_19, window_bounds = array<i64: 1, 96>}, {pipeline_mode = #tpu.pipeline_mode<synchronous>, transform_indices = @transform_20, window_bounds = array<i64: 96, 16>}, {pipeline_mode = #tpu.pipeline_mode<synchronous>, transform_indices = @transform_21, window_bounds = array<i64: 1, 16>}, {transform_indices = @transform_22, window_bounds = array<i64: 8, 16>}, {transform_indices = @transform_23, window_bounds = array<i64: 8, 16>}]} {
    %c0 = arith.constant 0 : index
    %c0_0 = arith.constant 0 : index
    %0 = vector.load %arg1[%c0, %c0_0] : memref<8x16xf32, #tpu.memory_space<vmem>>, vector<8x16xf32>
    %c0_1 = arith.constant 0 : index
    %c0_2 = arith.constant 0 : index
    %1 = vector.load %arg2[%c0_1, %c0_2] : memref<8x32xf32, #tpu.memory_space<vmem>>, vector<8x32xf32>
    %c0_3 = arith.constant 0 : index
    %c0_4 = arith.constant 0 : index
    %2 = vector.load %arg3[%c0_3, %c0_4] : memref<16x32xf32, #tpu.memory_space<vmem>>, vector<16x32xf32>
    %cst = arith.constant dense<0.000000e+00> : vector<8x32xf32>
    %3 = tpu.matmul %0, %2, %cst {dimension_numbers = #tpu.dot_dimension_numbers<[1], [0], [0], [1], [0, 0, 1, 1], [], []>} : vector<8x16xf32>, vector<16x32xf32>, vector<8x32xf32> -> vector<8x32xf32>
    %c0_5 = arith.constant 0 : index
    %c0_6 = arith.constant 0 : index
    %4 = vector.load %arg4[%c0_5, %c0_6] : memref<1x32xf32, #tpu.memory_space<vmem>>, vector<1x32xf32>
    %5 = vector.broadcast %4 : vector<1x32xf32> to vector<8x32xf32>
    %6 = arith.addf %3, %5 : vector<8x32xf32>
    %c0_7 = arith.constant 0 : index
    %c0_8 = arith.constant 0 : index
    %7 = vector.load %arg5[%c0_7, %c0_8] : memref<1x32xf32, #tpu.memory_space<vmem>>, vector<1x32xf32>
    %c0_9 = arith.constant 0 : index
    %c0_10 = arith.constant 0 : index
    %8 = vector.load %arg6[%c0_9, %c0_10] : memref<1x32xf32, #tpu.memory_space<vmem>>, vector<1x32xf32>
    %cst_11 = arith.constant dense<0.000000e+00> : vector<8xf32>
    %9 = vector.multi_reduction <add>, %6, %cst_11 [1] : vector<8x32xf32> to vector<8xf32>
    %10 = vector.shape_cast %9 : vector<8xf32> to vector<8x1xf32>
    %cst_12 = arith.constant 3.200000e+01 : f32
    %11 = vector.broadcast %cst_12 : f32 to vector<8x1xf32>
    %12 = arith.divf %10, %11 : vector<8x1xf32>
    %13 = vector.broadcast %12 : vector<8x1xf32> to vector<8x32xf32>
    %14 = arith.subf %6, %13 : vector<8x32xf32>
    %15 = vector.broadcast %12 : vector<8x1xf32> to vector<8x32xf32>
    %16 = arith.subf %6, %15 : vector<8x32xf32>
    %17 = arith.mulf %14, %16 : vector<8x32xf32>
    %cst_13 = arith.constant dense<0.000000e+00> : vector<8xf32>
    %18 = vector.multi_reduction <add>, %17, %cst_13 [1] : vector<8x32xf32> to vector<8xf32>
    %19 = vector.shape_cast %18 : vector<8xf32> to vector<8x1xf32>
    %cst_14 = arith.constant 3.200000e+01 : f32
    %20 = vector.broadcast %cst_14 : f32 to vector<8x1xf32>
    %21 = arith.divf %19, %20 : vector<8x1xf32>
    %22 = vector.broadcast %12 : vector<8x1xf32> to vector<8x32xf32>
    %23 = arith.subf %6, %22 : vector<8x32xf32>
    %cst_15 = arith.constant 9.99999974E-6 : f32
    %24 = vector.broadcast %cst_15 : f32 to vector<8x1xf32>
    %25 = arith.addf %21, %24 : vector<8x1xf32>
    %26 = math.rsqrt %25 : vector<8x1xf32>
    %27 = vector.broadcast %26 : vector<8x1xf32> to vector<8x32xf32>
    %28 = arith.mulf %23, %27 : vector<8x32xf32>
    %29 = vector.broadcast %7 : vector<1x32xf32> to vector<8x32xf32>
    %30 = arith.mulf %28, %29 : vector<8x32xf32>
    %31 = vector.broadcast %8 : vector<1x32xf32> to vector<8x32xf32>
    %32 = arith.addf %30, %31 : vector<8x32xf32>
    %cst_16 = arith.constant 2.000000e+01 : f32
    %33 = vector.broadcast %cst_16 : f32 to vector<8x32xf32>
    %34 = arith.minimumf %32, %33 : vector<8x32xf32>
    %35 = math.exp %34 : vector<8x32xf32>
    %cst_17 = arith.constant 2.000000e+00 : f32
    %36 = vector.broadcast %cst_17 : f32 to vector<8x32xf32>
    %37 = arith.addf %35, %36 : vector<8x32xf32>
    %38 = arith.mulf %35, %37 : vector<8x32xf32>
    %39 = arith.mulf %32, %38 : vector<8x32xf32>
    %cst_18 = arith.constant 2.000000e+00 : f32
    %40 = vector.broadcast %cst_18 : f32 to vector<8x32xf32>
    %41 = arith.addf %38, %40 : vector<8x32xf32>
    %42 = tpu.reciprocal %41 {approx = true} : vector<8x32xf32> -> vector<8x32xf32>
    %43 = arith.mulf %39, %42 : vector<8x32xf32>
    %c0_19 = arith.constant 0 : index
    %c0_20 = arith.constant 0 : index
    %44 = vector.load %arg7[%c0_19, %c0_20] : memref<32x16xf32, #tpu.memory_space<vmem>>, vector<32x16xf32>
    %cst_21 = arith.constant dense<0.000000e+00> : vector<8x16xf32>
    %45 = tpu.matmul %43, %44, %cst_21 {dimension_numbers = #tpu.dot_dimension_numbers<[1], [0], [0], [1], [0, 0, 1, 1], [], []>} : vector<8x32xf32>, vector<32x16xf32>, vector<8x16xf32> -> vector<8x16xf32>
    %c0_22 = arith.constant 0 : index
    %c0_23 = arith.constant 0 : index
    %46 = vector.load %arg8[%c0_22, %c0_23] : memref<1x16xf32, #tpu.memory_space<vmem>>, vector<1x16xf32>
    %47 = vector.broadcast %46 : vector<1x16xf32> to vector<8x16xf32>
    %48 = arith.addf %45, %47 : vector<8x16xf32>
    %c0_24 = arith.constant 0 : index
    %c0_25 = arith.constant 0 : index
    %49 = vector.load %arg9[%c0_24, %c0_25] : memref<32x96xf32, #tpu.memory_space<vmem>>, vector<32x96xf32>
    %cst_26 = arith.constant dense<0.000000e+00> : vector<8x96xf32>
    %50 = tpu.matmul %1, %49, %cst_26 {dimension_numbers = #tpu.dot_dimension_numbers<[1], [0], [0], [1], [0, 0, 1, 1], [], []>} : vector<8x32xf32>, vector<32x96xf32>, vector<8x96xf32> -> vector<8x96xf32>
    %c0_27 = arith.constant 0 : index
    %c0_28 = arith.constant 0 : index
    %51 = vector.load %arg10[%c0_27, %c0_28] : memref<16x96xf32, #tpu.memory_space<vmem>>, vector<16x96xf32>
    %cst_29 = arith.constant dense<0.000000e+00> : vector<8x96xf32>
    %52 = tpu.matmul %48, %51, %cst_29 {dimension_numbers = #tpu.dot_dimension_numbers<[1], [0], [0], [1], [0, 0, 1, 1], [], []>} : vector<8x16xf32>, vector<16x96xf32>, vector<8x96xf32> -> vector<8x96xf32>
    %53 = arith.addf %50, %52 : vector<8x96xf32>
    %c0_30 = arith.constant 0 : index
    %c0_31 = arith.constant 0 : index
    %54 = vector.load %arg11[%c0_30, %c0_31] : memref<1x96xf32, #tpu.memory_space<vmem>>, vector<1x96xf32>
    %55 = vector.broadcast %54 : vector<1x96xf32> to vector<8x96xf32>
    %56 = arith.addf %53, %55 : vector<8x96xf32>
    %c0_32 = arith.constant 0 : index
    %c0_33 = arith.constant 0 : index
    %57 = vector.load %arg12[%c0_32, %c0_33] : memref<1x96xf32, #tpu.memory_space<vmem>>, vector<1x96xf32>
    %c0_34 = arith.constant 0 : index
    %c0_35 = arith.constant 0 : index
    %58 = vector.load %arg13[%c0_34, %c0_35] : memref<1x96xf32, #tpu.memory_space<vmem>>, vector<1x96xf32>
    %cst_36 = arith.constant dense<0.000000e+00> : vector<8xf32>
    %59 = vector.multi_reduction <add>, %56, %cst_36 [1] : vector<8x96xf32> to vector<8xf32>
    %60 = vector.shape_cast %59 : vector<8xf32> to vector<8x1xf32>
    %cst_37 = arith.constant 9.600000e+01 : f32
    %61 = vector.broadcast %cst_37 : f32 to vector<8x1xf32>
    %62 = arith.divf %60, %61 : vector<8x1xf32>
    %63 = vector.broadcast %62 : vector<8x1xf32> to vector<8x96xf32>
    %64 = arith.subf %56, %63 : vector<8x96xf32>
    %65 = vector.broadcast %62 : vector<8x1xf32> to vector<8x96xf32>
    %66 = arith.subf %56, %65 : vector<8x96xf32>
    %67 = arith.mulf %64, %66 : vector<8x96xf32>
    %cst_38 = arith.constant dense<0.000000e+00> : vector<8xf32>
    %68 = vector.multi_reduction <add>, %67, %cst_38 [1] : vector<8x96xf32> to vector<8xf32>
    %69 = vector.shape_cast %68 : vector<8xf32> to vector<8x1xf32>
    %cst_39 = arith.constant 9.600000e+01 : f32
    %70 = vector.broadcast %cst_39 : f32 to vector<8x1xf32>
    %71 = arith.divf %69, %70 : vector<8x1xf32>
    %72 = vector.broadcast %62 : vector<8x1xf32> to vector<8x96xf32>
    %73 = arith.subf %56, %72 : vector<8x96xf32>
    %cst_40 = arith.constant 9.99999974E-6 : f32
    %74 = vector.broadcast %cst_40 : f32 to vector<8x1xf32>
    %75 = arith.addf %71, %74 : vector<8x1xf32>
    %76 = math.rsqrt %75 : vector<8x1xf32>
    %77 = vector.broadcast %76 : vector<8x1xf32> to vector<8x96xf32>
    %78 = arith.mulf %73, %77 : vector<8x96xf32>
    %79 = vector.broadcast %57 : vector<1x96xf32> to vector<8x96xf32>
    %80 = arith.mulf %78, %79 : vector<8x96xf32>
    %81 = vector.broadcast %58 : vector<1x96xf32> to vector<8x96xf32>
    %82 = arith.addf %80, %81 : vector<8x96xf32>
    %cst_41 = arith.constant 2.000000e+01 : f32
    %83 = vector.broadcast %cst_41 : f32 to vector<8x96xf32>
    %84 = arith.minimumf %82, %83 : vector<8x96xf32>
    %85 = math.exp %84 : vector<8x96xf32>
    %cst_42 = arith.constant 2.000000e+00 : f32
    %86 = vector.broadcast %cst_42 : f32 to vector<8x96xf32>
    %87 = arith.addf %85, %86 : vector<8x96xf32>
    %88 = arith.mulf %85, %87 : vector<8x96xf32>
    %89 = arith.mulf %82, %88 : vector<8x96xf32>
    %cst_43 = arith.constant 2.000000e+00 : f32
    %90 = vector.broadcast %cst_43 : f32 to vector<8x96xf32>
    %91 = arith.addf %88, %90 : vector<8x96xf32>
    %92 = tpu.reciprocal %91 {approx = true} : vector<8x96xf32> -> vector<8x96xf32>
    %93 = arith.mulf %89, %92 : vector<8x96xf32>
    %c0_44 = arith.constant 0 : index
    %c0_45 = arith.constant 0 : index
    %94 = vector.load %arg14[%c0_44, %c0_45] : memref<96x16xf32, #tpu.memory_space<vmem>>, vector<96x16xf32>
    %cst_46 = arith.constant dense<0.000000e+00> : vector<8x16xf32>
    %95 = tpu.matmul %93, %94, %cst_46 {dimension_numbers = #tpu.dot_dimension_numbers<[1], [0], [0], [1], [0, 0, 1, 1], [], []>} : vector<8x96xf32>, vector<96x16xf32>, vector<8x16xf32> -> vector<8x16xf32>
    %c0_47 = arith.constant 0 : index
    %c0_48 = arith.constant 0 : index
    %96 = vector.load %arg15[%c0_47, %c0_48] : memref<1x16xf32, #tpu.memory_space<vmem>>, vector<1x16xf32>
    %97 = vector.broadcast %96 : vector<1x16xf32> to vector<8x16xf32>
    %98 = arith.addf %95, %97 : vector<8x16xf32>
    %c0_49 = arith.constant 0 : index
    %c0_50 = arith.constant 0 : index
    %99 = vector.load %arg23[%c0_49, %c0_50] : memref<8x16xf32, #tpu.memory_space<vmem>>, vector<8x16xf32>
    tpu.vector_store %arg23[%c0_49, %c0_50], %98 {strides = array<i32>} : memref<8x16xf32, #tpu.memory_space<vmem>>, vector<8x16xf32>,
    %c0_51 = arith.constant 0 : index
    %c0_52 = arith.constant 0 : index
    %100 = vector.load %arg16[%c0_51, %c0_52] : memref<32x96xf32, #tpu.memory_space<vmem>>, vector<32x96xf32>
    %cst_53 = arith.constant dense<0.000000e+00> : vector<8x96xf32>
    %101 = tpu.matmul %1, %100, %cst_53 {dimension_numbers = #tpu.dot_dimension_numbers<[1], [0], [0], [1], [0, 0, 1, 1], [], []>} : vector<8x32xf32>, vector<32x96xf32>, vector<8x96xf32> -> vector<8x96xf32>
    %c0_54 = arith.constant 0 : index
    %c0_55 = arith.constant 0 : index
    %102 = vector.load %arg17[%c0_54, %c0_55] : memref<16x96xf32, #tpu.memory_space<vmem>>, vector<16x96xf32>
    %cst_56 = arith.constant dense<0.000000e+00> : vector<8x96xf32>
    %103 = tpu.matmul %48, %102, %cst_56 {dimension_numbers = #tpu.dot_dimension_numbers<[1], [0], [0], [1], [0, 0, 1, 1], [], []>} : vector<8x16xf32>, vector<16x96xf32>, vector<8x96xf32> -> vector<8x96xf32>
    %104 = arith.addf %101, %103 : vector<8x96xf32>
    %c0_57 = arith.constant 0 : index
    %c0_58 = arith.constant 0 : index
    %105 = vector.load %arg18[%c0_57, %c0_58] : memref<1x96xf32, #tpu.memory_space<vmem>>, vector<1x96xf32>
    %106 = vector.broadcast %105 : vector<1x96xf32> to vector<8x96xf32>
    %107 = arith.addf %104, %106 : vector<8x96xf32>
    %c0_59 = arith.constant 0 : index
    %c0_60 = arith.constant 0 : index
    %108 = vector.load %arg19[%c0_59, %c0_60] : memref<1x96xf32, #tpu.memory_space<vmem>>, vector<1x96xf32>
    %c0_61 = arith.constant 0 : index
    %c0_62 = arith.constant 0 : index
    %109 = vector.load %arg20[%c0_61, %c0_62] : memref<1x96xf32, #tpu.memory_space<vmem>>, vector<1x96xf32>
    %cst_63 = arith.constant dense<0.000000e+00> : vector<8xf32>
    %110 = vector.multi_reduction <add>, %107, %cst_63 [1] : vector<8x96xf32> to vector<8xf32>
    %111 = vector.shape_cast %110 : vector<8xf32> to vector<8x1xf32>
    %cst_64 = arith.constant 9.600000e+01 : f32
    %112 = vector.broadcast %cst_64 : f32 to vector<8x1xf32>
    %113 = arith.divf %111, %112 : vector<8x1xf32>
    %114 = vector.broadcast %113 : vector<8x1xf32> to vector<8x96xf32>
    %115 = arith.subf %107, %114 : vector<8x96xf32>
    %116 = vector.broadcast %113 : vector<8x1xf32> to vector<8x96xf32>
    %117 = arith.subf %107, %116 : vector<8x96xf32>
    %118 = arith.mulf %115, %117 : vector<8x96xf32>
    %cst_65 = arith.constant dense<0.000000e+00> : vector<8xf32>
    %119 = vector.multi_reduction <add>, %118, %cst_65 [1] : vector<8x96xf32> to vector<8xf32>
    %120 = vector.shape_cast %119 : vector<8xf32> to vector<8x1xf32>
    %cst_66 = arith.constant 9.600000e+01 : f32
    %121 = vector.broadcast %cst_66 : f32 to vector<8x1xf32>
    %122 = arith.divf %120, %121 : vector<8x1xf32>
    %123 = vector.broadcast %113 : vector<8x1xf32> to vector<8x96xf32>
    %124 = arith.subf %107, %123 : vector<8x96xf32>
    %cst_67 = arith.constant 9.99999974E-6 : f32
    %125 = vector.broadcast %cst_67 : f32 to vector<8x1xf32>
    %126 = arith.addf %122, %125 : vector<8x1xf32>
    %127 = math.rsqrt %126 : vector<8x1xf32>
    %128 = vector.broadcast %127 : vector<8x1xf32> to vector<8x96xf32>
    %129 = arith.mulf %124, %128 : vector<8x96xf32>
    %130 = vector.broadcast %108 : vector<1x96xf32> to vector<8x96xf32>
    %131 = arith.mulf %129, %130 : vector<8x96xf32>
    %132 = vector.broadcast %109 : vector<1x96xf32> to vector<8x96xf32>
    %133 = arith.addf %131, %132 : vector<8x96xf32>
    %cst_68 = arith.constant 2.000000e+01 : f32
    %134 = vector.broadcast %cst_68 : f32 to vector<8x96xf32>
    %135 = arith.minimumf %133, %134 : vector<8x96xf32>
    %136 = math.exp %135 : vector<8x96xf32>
    %cst_69 = arith.constant 2.000000e+00 : f32
    %137 = vector.broadcast %cst_69 : f32 to vector<8x96xf32>
    %138 = arith.addf %136, %137 : vector<8x96xf32>
    %139 = arith.mulf %136, %138 : vector<8x96xf32>
    %140 = arith.mulf %133, %139 : vector<8x96xf32>
    %cst_70 = arith.constant 2.000000e+00 : f32
    %141 = vector.broadcast %cst_70 : f32 to vector<8x96xf32>
    %142 = arith.addf %139, %141 : vector<8x96xf32>
    %143 = tpu.reciprocal %142 {approx = true} : vector<8x96xf32> -> vector<8x96xf32>
    %144 = arith.mulf %140, %143 : vector<8x96xf32>
    %c0_71 = arith.constant 0 : index
    %c0_72 = arith.constant 0 : index
    %145 = vector.load %arg21[%c0_71, %c0_72] : memref<96x16xf32, #tpu.memory_space<vmem>>, vector<96x16xf32>
    %cst_73 = arith.constant dense<0.000000e+00> : vector<8x16xf32>
    %146 = tpu.matmul %144, %145, %cst_73 {dimension_numbers = #tpu.dot_dimension_numbers<[1], [0], [0], [1], [0, 0, 1, 1], [], []>} : vector<8x96xf32>, vector<96x16xf32>, vector<8x16xf32> -> vector<8x16xf32>
    %c0_74 = arith.constant 0 : index
    %c0_75 = arith.constant 0 : index
    %147 = vector.load %arg22[%c0_74, %c0_75] : memref<1x16xf32, #tpu.memory_space<vmem>>, vector<1x16xf32>
    %148 = vector.broadcast %147 : vector<1x16xf32> to vector<8x16xf32>
    %149 = arith.addf %146, %148 : vector<8x16xf32>
    %c0_76 = arith.constant 0 : index
    %c0_77 = arith.constant 0 : index
    %150 = vector.load %arg24[%c0_76, %c0_77] : memref<8x16xf32, #tpu.memory_space<vmem>>, vector<8x16xf32>
    tpu.vector_store %arg24[%c0_76, %c0_77], %149 {strides = array<i32>} : memref<8x16xf32, #tpu.memory_space<vmem>>, vector<8x16xf32>,
    return
  }
  func.func @transform_0(%arg0: i32) -> (i32, i32) {
    %c0_i32 = arith.constant 0 : i32
    %c0_i32_0 = arith.constant 0 : i32
    return %arg0, %c0_i32 : i32, i32
  }
  func.func @transform_1(%arg0: i32) -> (i32, i32) {
    %c0_i32 = arith.constant 0 : i32
    %c0_i32_0 = arith.constant 0 : i32
    return %arg0, %c0_i32 : i32, i32
  }
  func.func @transform_2(%arg0: i32) -> (i32, i32) {
    %c0_i32 = arith.constant 0 : i32
    %c0_i32_0 = arith.constant 0 : i32
    %c0_i32_1 = arith.constant 0 : i32
    return %c0_i32, %c0_i32_0 : i32, i32
  }
  func.func @transform_3(%arg0: i32) -> (i32, i32) {
    %c0_i32 = arith.constant 0 : i32
    %c0_i32_0 = arith.constant 0 : i32
    %c0_i32_1 = arith.constant 0 : i32
    return %c0_i32, %c0_i32_0 : i32, i32
  }
  func.func @transform_4(%arg0: i32) -> (i32, i32) {
    %c0_i32 = arith.constant 0 : i32
    %c0_i32_0 = arith.constant 0 : i32
    %c0_i32_1 = arith.constant 0 : i32
    return %c0_i32, %c0_i32_0 : i32, i32
  }
  func.func @transform_5(%arg0: i32) -> (i32, i32) {
    %c0_i32 = arith.constant 0 : i32
    %c0_i32_0 = arith.constant 0 : i32
    %c0_i32_1 = arith.constant 0 : i32
    return %c0_i32, %c0_i32_0 : i32, i32
  }
  func.func @transform_6(%arg0: i32) -> (i32, i32) {
    %c0_i32 = arith.constant 0 : i32
    %c0_i32_0 = arith.constant 0 : i32
    %c0_i32_1 = arith.constant 0 : i32
    return %c0_i32, %c0_i32_0 : i32, i32
  }
  func.func @transform_7(%arg0: i32) -> (i32, i32) {
    %c0_i32 = arith.constant 0 : i32
    %c0_i32_0 = arith.constant 0 : i32
    %c0_i32_1 = arith.constant 0 : i32
    return %c0_i32, %c0_i32_0 : i32, i32
  }
  func.func @transform_8(%arg0: i32) -> (i32, i32) {
    %c0_i32 = arith.constant 0 : i32
    %c0_i32_0 = arith.constant 0 : i32
    %c0_i32_1 = arith.constant 0 : i32
    return %c0_i32, %c0_i32_0 : i32, i32
  }
  func.func @transform_9(%arg0: i32) -> (i32, i32) {
    %c0_i32 = arith.constant 0 : i32
    %c0_i32_0 = arith.constant 0 : i32
    %c0_i32_1 = arith.constant 0 : i32
    return %c0_i32, %c0_i32_0 : i32, i32
  }
  func.func @transform_10(%arg0: i32) -> (i32, i32) {
    %c0_i32 = arith.constant 0 : i32
    %c0_i32_0 = arith.constant 0 : i32
    %c0_i32_1 = arith.constant 0 : i32
    return %c0_i32, %c0_i32_0 : i32, i32
  }
  func.func @transform_11(%arg0: i32) -> (i32, i32) {
    %c0_i32 = arith.constant 0 : i32
    %c0_i32_0 = arith.constant 0 : i32
    %c0_i32_1 = arith.constant 0 : i32
    return %c0_i32, %c0_i32_0 : i32, i32
  }
  func.func @transform_12(%arg0: i32) -> (i32, i32) {
    %c0_i32 = arith.constant 0 : i32
    %c0_i32_0 = arith.constant 0 : i32
    %c0_i32_1 = arith.constant 0 : i32
    return %c0_i32, %c0_i32_0 : i32, i32
  }
  func.func @transform_13(%arg0: i32) -> (i32, i32) {
    %c0_i32 = arith.constant 0 : i32
    %c0_i32_0 = arith.constant 0 : i32
    %c0_i32_1 = arith.constant 0 : i32
    return %c0_i32, %c0_i32_0 : i32, i32
  }
  func.func @transform_14(%arg0: i32) -> (i32, i32) {
    %c0_i32 = arith.constant 0 : i32
    %c0_i32_0 = arith.constant 0 : i32
    %c0_i32_1 = arith.constant 0 : i32
    return %c0_i32, %c0_i32_0 : i32, i32
  }
  func.func @transform_15(%arg0: i32) -> (i32, i32) {
    %c0_i32 = arith.constant 0 : i32
    %c0_i32_0 = arith.constant 0 : i32
    %c0_i32_1 = arith.constant 0 : i32
    return %c0_i32, %c0_i32_0 : i32, i32
  }
  func.func @transform_16(%arg0: i32) -> (i32, i32) {
    %c0_i32 = arith.constant 0 : i32
    %c0_i32_0 = arith.constant 0 : i32
    %c0_i32_1 = arith.constant 0 : i32
    return %c0_i32, %c0_i32_0 : i32, i32
  }
  func.func @transform_17(%arg0: i32) -> (i32, i32) {
    %c0_i32 = arith.constant 0 : i32
    %c0_i32_0 = arith.constant 0 : i32
    %c0_i32_1 = arith.constant 0 : i32
    return %c0_i32, %c0_i32_0 : i32, i32
  }
  func.func @transform_18(%arg0: i32) -> (i32, i32) {
    %c0_i32 = arith.constant 0 : i32
    %c0_i32_0 = arith.constant 0 : i32
    %c0_i32_1 = arith.constant 0 : i32
    return %c0_i32, %c0_i32_0 : i32, i32
  }
  func.func @transform_19(%arg0: i32) -> (i32, i32) {
    %c0_i32 = arith.constant 0 : i32
    %c0_i32_0 = arith.constant 0 : i32
    %c0_i32_1 = arith.constant 0 : i32
    return %c0_i32, %c0_i32_0 : i32, i32
  }
  func.func @transform_20(%arg0: i32) -> (i32, i32) {
    %c0_i32 = arith.constant 0 : i32
    %c0_i32_0 = arith.constant 0 : i32
    %c0_i32_1 = arith.constant 0 : i32
    return %c0_i32, %c0_i32_0 : i32, i32
  }
  func.func @transform_21(%arg0: i32) -> (i32, i32) {
    %c0_i32 = arith.constant 0 : i32
    %c0_i32_0 = arith.constant 0 : i32
    %c0_i32_1 = arith.constant 0 : i32
    return %c0_i32, %c0_i32_0 : i32, i32
  }
  func.func @transform_22(%arg0: i32) -> (i32, i32) {
    %c0_i32 = arith.constant 0 : i32
    %c0_i32_0 = arith.constant 0 : i32
    return %arg0, %c0_i32 : i32, i32
  }
  func.func @transform_23(%arg0: i32) -> (i32, i32) {
    %c0_i32 = arith.constant 0 : i32
    %c0_i32_0 = arith.constant 0 : i32
    return %arg0, %c0_i32 : i32, i32
  }
}

</mosaic_0001>

<bundles_post_ra>
// kernel: tpu_custom_call.1
= control target key start
LH: loop header
LB: loop body
LE: loop exit
PB: predicated region body
PF: predicated region fallthrough
CT: control target
= control target key end

     0   :  { %s1516_s0 = inlined_call_operand.vmem [shape: f32[8,16], index: 0, kind: input, shape index: {}]   ;;  %s1517_s1 = inlined_call_operand.vmem [shape: f32[8,32], index: 1, kind: input, shape index: {}]   ;;  %s1518_s2 = inlined_call_operand.vmem [shape: f32[16,32], index: 2, kind: input, shape index: {}]   ;;  %s1519_s3 = inlined_call_operand.vmem [shape: f32[1,32], index: 3, kind: input, shape index: {}]   ;;  %s1520_s4 = inlined_call_operand.vmem [shape: f32[1,32], index: 4, kind: input, shape index: {}]   ;;  %s1521_s5 = inlined_call_operand.vmem [shape: f32[1,32], index: 5, kind: input, shape index: {}]   ;;  %s1522_s6 = inlined_call_operand.vmem [shape: f32[32,16], index: 6, kind: input, shape index: {}]   ;;  %s1523_s7 = inlined_call_operand.vmem [shape: f32[1,16], index: 7, kind: input, shape index: {}]   ;;  %s1524_s8 = inlined_call_operand.vmem [shape: f32[32,96], index: 8, kind: input, shape index: {}]   ;;  %s1525_s9 = inlined_call_operand.vmem [shape: f32[16,96], index: 9, kind: input, shape index: {}]   ;;  %s1526_s10 = inlined_call_operand.vmem [shape: f32[1,96], index: 10, kind: input, shape index: {}]   ;;  %s1527_s11 = inlined_call_operand.vmem [shape: f32[1,96], index: 11, kind: input, shape index: {}]   ;;  %s1528_s12 = inlined_call_operand.vmem [shape: f32[1,96], index: 12, kind: input, shape index: {}]   ;;  %s1529_s13 = inlined_call_operand.vmem [shape: f32[96,16], index: 13, kind: input, shape index: {}]   ;;  %s1530_s14 = inlined_call_operand.vmem [shape: f32[1,16], index: 14, kind: input, shape index: {}]   ;;  %s1531_s15 = inlined_call_operand.vmem [shape: f32[32,96], index: 15, kind: input, shape index: {}]   ;;  %s1532_s16 = inlined_call_operand.vmem [shape: f32[16,96], index: 16, kind: input, shape index: {}]   ;;  %s1533_s17 = inlined_call_operand.vmem [shape: f32[1,96], index: 17, kind: input, shape index: {}]   ;;  %s1534_s18 = inlined_call_operand.vmem [shape: f32[1,96], index: 18, kind: input, shape index: {}]   ;;  %s1535_s19 = inlined_call_operand.vmem [shape: f32[1,96], index: 19, kind: input, shape index: {}]   ;;  %s1536_s20 = inlined_call_operand.vmem [shape: f32[96,16], index: 20, kind: input, shape index: {}]   ;;  %s1537_s21 = inlined_call_operand.vmem [shape: f32[1,16], index: 21, kind: input, shape index: {}]   ;;  %s1538_s22 = inlined_call_operand.hbm [shape: f32[8,16], index: 22, kind: output, shape index: {0}]   ;;  %s1539_s23 = inlined_call_operand.hbm [shape: f32[8,16], index: 23, kind: output, shape index: {1}]  }
   0x1   :  { %1542 = sst [smem:[#allocation8_spill]] %s1516_s0 }
   0x2   :  { %1543 = sst [smem:[#allocation9_spill]] %s1517_s1 }
   0x3   :  { %1544 = sst [smem:[#allocation10_spill]] %s1518_s2 }
   0x4   :  { %1545 = sst [smem:[#allocation11_spill]] %s1519_s3 }
   0x5   :  { %1546 = sst [smem:[#allocation12_spill]] %s1520_s4 }
   0x6   :  { %1547 = sst [smem:[#allocation13_spill]] %s1521_s5 }
   0x7   :  { %1548 = sst [smem:[#allocation14_spill]] %s1522_s6 }
   0x8   :  { %1549 = sst [smem:[#allocation15_spill]] %s1523_s7 }
   0x9   :  { %29 = vsyncpa [#allocation3], 0  ;;  %s1550_s24 = sld [smem:[#allocation10_spill]]  ;;  %v1134_v1 = vmov 0.0   ;;  %vm1135_vm0 = vmmov 0  }
   0xa   :  { %960 = vmatprep.subr.mxu0 %v1134_v1  ;;  %964 = vmatprep.mubr.msk.f32.mxu0 %vm1135_vm0, %v1134_v1 }
   0xf   :  { %v78_v0 = vld [vmem:[%s1550_s24 + $0x8] sm:$0xff]  ;;  %v77_v2 = vld [vmem:[%s1550_s24] sm:$0xff] }
  0x10   :  { %30 = vsyncpa [#allocation5], 0  ;;  %961 = vmatpush3.msra.mxu0 %v78_v0  ;;  %s1551_s2 = sld [smem:[#allocation8_spill]]  ;;  %vm86_vm1 = vcmask 130048   ;;  %967 = vmatprep.subr.mxu1 %v1134_v1  ;;  %vm162_vm2 = vcmask 261120   ;;  %v289_v18 = vld [vmem:[%s1525_s9 + $0x8] sm:$0xff] }
  0x11   :  { %962 = vmatprep.subr.mxu0 %v1134_v1  ;;  %975 = vmatprep.mubr.msk.f32.mxu1 %vm1135_vm0, %v1134_v1  ;;  %s1552_s7 = sld [smem:[#allocation11_spill]]  ;;  %v287_v37 = vld [vmem:[%s1524_s8 + $0x18] sm:$0xff]  ;;  %v286_v38 = vld [vmem:[%s1524_s8 + $0x10] sm:$0xff]  ;;  %v285_v39 = vld [vmem:[%s1524_s8 + $0x8] sm:$0xff]  ;;  %vm446_vm3 = vcmask 785408  }
  0x12   :  { %963 = vmatpush3.msra.mxu0 %v77_v2  ;;  %s1553_s3 = sld [smem:[#allocation14_spill]]  ;;  %v288_v40 = vld [vmem:[%s1525_s9] sm:$0xff]  ;;  %v582_v46 = vld [vmem:[%s1532_s16 + $0x8] sm:$0xff]  ;;  %v580_v49 = vld [vmem:[%s1531_s15 + $0x18] sm:$0xff] }
  0x13   :  { %978 = vmatprep.subr.mxu0 %v1134_v1  ;;  %s1554_s27 = sld [smem:[#allocation12_spill]]  ;;  %v284_v41 = vld [vmem:[%s1524_s8] sm:$0xff]  ;;  %v579_v50 = vld [vmem:[%s1531_s15 + $0x10] sm:$0xff]  ;;  %v578_v51 = vld [vmem:[%s1531_s15 + $0x8] sm:$0xff] }
  0x14   :  { %s1555_s29 = sld [smem:[#allocation13_spill]]  ;;  %v581_v48 = vld [vmem:[%s1532_s16] sm:$0xff] }
  0x15   :  { %v577_v52 = vld [vmem:[%s1531_s15] sm:$0xff] }
  0x16   :  { %v75_v3 = vld [vmem:[%s1551_s2] sm:$0xff] }
  0x17   :  { %965 = vmatmul.mubr.msk.f32.vlgmr.msra.gmra.mxu0 %vm86_vm1, %v75_v3  ;;  %v890_v4 = vld [vmem:[%s1552_s7] ss:$0 sm:$0xff]  ;;  %s1556_s7 = sld [smem:[#allocation9_spill]] }
  0x18   :  { %982 = vmatprep.mubr.msk.f32.mxu0 %vm1135_vm0, %v1134_v1  ;;  %v203_v14 = vld [vmem:[%s1553_s3 + $0x18] sm:$0xff]  ;;  %v202_v15 = vld [vmem:[%s1553_s3 + $0x10] sm:$0xff]  ;;  %v201_v16 = vld [vmem:[%s1553_s3 + $0x8] sm:$0xff]  ;;  %979 = vmatpush3.msra.mxu0 %v289_v18 }
  0x19   :  { %968 = vmatpush3.msra.mxu1 %v203_v14  ;;  %v200_v17 = vld [vmem:[%s1553_s3] sm:$0xff]  ;;  %980 = vmatprep.subr.mxu0 %v1134_v1  ;;  %v493_v18 = vld [vmem:[%s1529_s13 + $0x48] sm:$0xff] }
  0x1a   :  { %969 = vmatprep.subr.mxu1 %v1134_v1  ;;  %v892_v23 = vld [vmem:[%s1554_s27] ss:$0 sm:$0xff]  ;;  %981 = vmatpush3.msra.mxu0 %v288_v40 }
  0x1b   :  { %970 = vmatpush3.msra.mxu1 %v202_v15  ;;  %v893_v25 = vld [vmem:[%s1555_s29] ss:$0 sm:$0xff]  ;;  %1023 = vmatprep.subr.mxu0 %v1134_v1  ;;  %s1557_s29 = sld [smem:[#allocation15_spill]] }
  0x1c   :  { %971 = vmatprep.subr.mxu1 %v1134_v1  ;;  %v898_v56 = vld [vmem:[%s1526_s10] ss:$0 sm:$0xff] }
  0x1d   :  { %972 = vmatpush3.msra.mxu1 %v201_v16  ;;  %v76_v42 = vld [vmem:[%s1556_s7] sm:$0xff]  ;;  %v495_v16 = vld [vmem:[%s1529_s13 + $0x58] sm:$0xff] }
  0x1e   :  { %973 = vmatprep.subr.mxu1 %v1134_v1  ;;  %v905_v0 = vld [vmem:[%s1533_s17] ss:$0 sm:$0xff] }
  0x1f   :  { %974 = vmatpush3.msra.mxu1 %v200_v17  ;;  %v494_v17 = vld [vmem:[%s1529_s13 + $0x50] sm:$0xff] }
  0x20   :  { %985 = vmatprep.subr.mxu1 %v1134_v1 }
  0x21   :  { %v894_v43 = vld [vmem:[%s1557_s29] ss:$0 sm:$0xff] }
  0xd7   :  { %v156_v5 = vpop.f32.mrf.mxu0 }
  0xd8   :  { %v157_v6 = vadd.f32 %v890_v4, %v156_v5 }
  0xd9   :  { %v966_v7 = vpop.f32.mrf.mxu0 }
  0xda   :  { %v163_v8 = vsel %vm162_vm2, %v157_v6, 0.0 }
  0xdb   :  { %164 = vadd.xlane.f32.xlu0 %v163_v8 }
 0x164   :  { %v165_v9 = vpop.xlane.xlu0 %164 }
 0x165   :  { %v167_v10 = vmul.f32 0.03125, %v165_v9 }
 0x167   :  { %v168_v11 = vsub.f32 %v157_v6, %v167_v10 }
 0x169   :  { %v169_v12 = vmul.f32 %v168_v11, %v168_v11 }
 0x16b   :  { %v170_v13 = vsel %vm162_vm2, %v169_v12, 0.0 }
 0x16c   :  { %171 = vadd.xlane.f32.xlu0 %v170_v13 }
 0x1f5   :  { %v172_v19 = vpop.xlane.xlu0 %171 }
 0x1f6   :  { %v173_v20 = vmul.f32 0.03125, %v172_v19  ;;  %v780_v19 = vld [vmem:[%s1536_s20 + $0x58] sm:$0xff] }
 0x1f8   :  { %v174_v21 = vadd.f32 1e-05, %v173_v20  ;;  %v779_v20 = vld [vmem:[%s1536_s20 + $0x50] sm:$0xff] }
 0x1fa   :  { %1072 = vrsqrt.f32 %v174_v21  ;;  %v492_v21 = vld [vmem:[%s1529_s13 + $0x40] sm:$0xff] }
 0x207   :  { %v1073_v22 = vpop.eup %1072 }
 0x208   :  { %v176_v24 = vmul.f32 %v1073_v22, %v168_v11  ;;  %v778_v22 = vld [vmem:[%s1536_s20 + $0x48] sm:$0xff] }
 0x20a   :  { %v183_v26 = vmul.f32 %v892_v23, %v176_v24  ;;  %v491_v23 = vld [vmem:[%s1529_s13 + $0x38] sm:$0xff]  ;;  %v777_v24 = vld [vmem:[%s1536_s20 + $0x40] sm:$0xff] }
 0x20c   :  { %v190_v27 = vadd.f32 %v893_v25, %v183_v26  ;;  %v490_v25 = vld [vmem:[%s1529_s13 + $0x30] sm:$0xff]  ;;  %v776_v26 = vld [vmem:[%s1536_s20 + $0x38] sm:$0xff] }
 0x20e   :  { %v191_v28 = vmin.f32 %v190_v27, 20.0 }
 0x210   :  { %v192_v29 = vmul.f32 1.442695, %v191_v28  ;;  %v775_v28 = vld [vmem:[%s1536_s20 + $0x30] sm:$0xff] }
 0x212   :  { %1074 = vpow2.f32 %v192_v29  ;;  %v488_v29 = vld [vmem:[%s1529_s13 + $0x20] sm:$0xff] }
 0x21f   :  { %v1075_v30 = vpop.eup %1074 }
 0x220   :  { %v194_v31 = vadd.f32 2.0, %v1075_v30 }
 0x222   :  { %v195_v32 = vmul.f32 %v1075_v30, %v194_v31  ;;  %v487_v30 = vld [vmem:[%s1529_s13 + $0x18] sm:$0xff]  ;;  %v486_v31 = vld [vmem:[%s1529_s13 + $0x10] sm:$0xff] }
 0x224   :  { %v197_v33 = vadd.f32 2.0, %v195_v32  ;;  %v196_v34 = vmul.f32 %v195_v32, %v190_v27  ;;  %v489_v27 = vld [vmem:[%s1529_s13 + $0x28] sm:$0xff] }
 0x225   :  { %v485_v32 = vld [vmem:[%s1529_s13 + $0x8] sm:$0xff] }
 0x226   :  { %1076 = vrcp.f32 %v197_v33  ;;  %v484_v33 = vld [vmem:[%s1529_s13] sm:$0xff] }
 0x233   :  { %v1077_v35 = vpop.eup %1076 }
 0x234   :  { %v199_v36 = vmul.f32 %v1077_v35, %v196_v34  ;;  %v774_v34 = vld [vmem:[%s1536_s20 + $0x28] sm:$0xff]  ;;  %v773_v35 = vld [vmem:[%s1536_s20 + $0x20] sm:$0xff] }
 0x236   :  { %976 = vmatmul.mubr.msk.f32.vlgmr.msra.gmra.mxu1 %vm162_vm2, %v199_v36  ;;  %v772_v36 = vld [vmem:[%s1536_s20 + $0x18] sm:$0xff] }
 0x237   :  { %986 = vmatpush3.msra.mxu1 %v287_v37  ;;  %993 = vmatprep.mubr.msk.f32.mxu1 %vm1135_vm0, %v1134_v1  ;;  %v771_v37 = vld [vmem:[%s1536_s20 + $0x10] sm:$0xff] }
 0x238   :  { %987 = vmatprep.subr.mxu1 %v1134_v1 }
 0x239   :  { %988 = vmatpush3.msra.mxu1 %v286_v38  ;;  %v770_v38 = vld [vmem:[%s1536_s20 + $0x8] sm:$0xff] }
 0x23a   :  { %989 = vmatprep.subr.mxu1 %v1134_v1 }
 0x23b   :  { %990 = vmatpush3.msra.mxu1 %v285_v39  ;;  %v769_v39 = vld [vmem:[%s1536_s20] sm:$0xff] }
 0x23c   :  { %991 = vmatprep.subr.mxu1 %v1134_v1 }
 0x23d   :  { %992 = vmatpush3.msra.mxu1 %v284_v41 }
 0x23e   :  { %994 = vmatmul.mubr.msk.f32.vlgmr.msra.gmra.mxu1 %vm162_vm2, %v76_v42  ;;  %996 = vmatprep.subr.mxu1 %v1134_v1 }
 0x23f   :  { %1020 = vmatprep.mubr.msk.f32.mxu1 %vm1135_vm0, %v1134_v1  ;;  %997 = vmatpush3.msra.mxu1 %v495_v16 }
 0x240   :  { %998 = vmatprep.subr.mxu1 %v1134_v1 }
 0x241   :  { %999 = vmatpush3.msra.mxu1 %v494_v17 }
 0x242   :  { %1000 = vmatprep.subr.mxu1 %v1134_v1 }
 0x243   :  { %1001 = vmatpush3.msra.mxu1 %v493_v18 }
 0x244   :  { %1002 = vmatprep.subr.mxu1 %v1134_v1 }
 0x245   :  { %1003 = vmatpush3.msra.mxu1 %v492_v21 }
 0x246   :  { %1004 = vmatprep.subr.mxu1 %v1134_v1 }
 0x247   :  { %1005 = vmatpush3.msra.mxu1 %v491_v23 }
 0x248   :  { %1006 = vmatprep.subr.mxu1 %v1134_v1 }
 0x249   :  { %1007 = vmatpush3.msra.mxu1 %v490_v25 }
 0x24a   :  { %1008 = vmatprep.subr.mxu1 %v1134_v1 }
 0x24b   :  { %1009 = vmatpush3.msra.mxu1 %v489_v27 }
 0x24c   :  { %1010 = vmatprep.subr.mxu1 %v1134_v1 }
 0x24d   :  { %1011 = vmatpush3.msra.mxu1 %v488_v29 }
 0x24e   :  { %1012 = vmatprep.subr.mxu1 %v1134_v1 }
 0x24f   :  { %1013 = vmatpush3.msra.mxu1 %v487_v30 }
 0x250   :  { %1014 = vmatprep.subr.mxu1 %v1134_v1 }
 0x251   :  { %1015 = vmatpush3.msra.mxu1 %v486_v31 }
 0x252   :  { %1016 = vmatprep.subr.mxu1 %v1134_v1 }
 0x253   :  { %1017 = vmatpush3.msra.mxu1 %v485_v32 }
 0x254   :  { %1018 = vmatprep.subr.mxu1 %v1134_v1 }
 0x255   :  { %1019 = vmatpush3.msra.mxu1 %v484_v33 }
 0x2f6   :  { %v280_v44 = vpop.f32.mrf.mxu1 }
 0x2f7   :  { %v281_v45 = vadd.f32 %v894_v43, %v280_v44 }
 0x2f8   :  { %v977_v47 = vpop.f32.mrf.mxu1 }
 0x2f9   :  { %983 = vmatmul.mubr.msk.f32.vlgmr.msra.gmra.mxu0 %vm86_vm1, %v281_v45  ;;  %v899_v47 = vld [vmem:[%s1527_s11] ss:$0 sm:$0xff] }
 0x2fa   :  { %1024 = vmatpush3.msra.mxu0 %v582_v46  ;;  %1027 = vmatprep.mubr.msk.f32.mxu0 %vm1135_vm0, %v1134_v1 }
 0x2fb   :  { %1025 = vmatprep.subr.mxu0 %v1134_v1 }
 0x2fc   :  { %1026 = vmatpush3.msra.mxu0 %v581_v48 }
 0x2fd   :  { %1030 = vmatprep.subr.mxu0 %v1134_v1  ;;  %1028 = vmatmul.mubr.msk.f32.vlgmr.msra.gmra.mxu0 %vm86_vm1, %v281_v45 }
 0x2fe   :  { %1031 = vmatpush3.msra.mxu0 %v580_v49  ;;  %1038 = vmatprep.mubr.msk.f32.mxu0 %vm1135_vm0, %v1134_v1  ;;  %v432_v53 = vpop.f32.mrf.mxu1 }
 0x2ff   :  { %1032 = vmatprep.subr.mxu0 %v1134_v1 }
 0x300   :  { %1033 = vmatpush3.msra.mxu0 %v579_v50  ;;  %v995_v54 = vpop.f32.mrf.mxu1 }
 0x301   :  { %1034 = vmatprep.subr.mxu0 %v1134_v1  ;;  %v906_v54 = vld [vmem:[%s1534_s18] ss:$0 sm:$0xff] }
 0x302   :  { %1035 = vmatpush3.msra.mxu0 %v578_v51 }
 0x303   :  { %1036 = vmatprep.subr.mxu0 %v1134_v1 }
 0x304   :  { %1037 = vmatpush3.msra.mxu0 %v577_v52 }
 0x305   :  { %1039 = vmatmul.mubr.msk.f32.vlgmr.msra.gmra.mxu0 %vm162_vm2, %v76_v42  ;;  %1041 = vmatprep.subr.mxu0 %v1134_v1 }
 0x306   :  { %1065 = vmatprep.mubr.msk.f32.mxu0 %vm1135_vm0, %v1134_v1  ;;  %1042 = vmatpush3.msra.mxu0 %v780_v19 }
 0x307   :  { %1043 = vmatprep.subr.mxu0 %v1134_v1 }
 0x308   :  { %1044 = vmatpush3.msra.mxu0 %v779_v20 }
 0x309   :  { %1045 = vmatprep.subr.mxu0 %v1134_v1 }
 0x30a   :  { %1046 = vmatpush3.msra.mxu0 %v778_v22 }
 0x30b   :  { %1047 = vmatprep.subr.mxu0 %v1134_v1 }
 0x30c   :  { %1048 = vmatpush3.msra.mxu0 %v777_v24 }
 0x30d   :  { %1049 = vmatprep.subr.mxu0 %v1134_v1 }
 0x30e   :  { %1050 = vmatpush3.msra.mxu0 %v776_v26 }
 0x30f   :  { %1051 = vmatprep.subr.mxu0 %v1134_v1 }
 0x310   :  { %1052 = vmatpush3.msra.mxu0 %v775_v28 }
 0x311   :  { %1053 = vmatprep.subr.mxu0 %v1134_v1 }
 0x312   :  { %1054 = vmatpush3.msra.mxu0 %v774_v34 }
 0x313   :  { %1055 = vmatprep.subr.mxu0 %v1134_v1 }
 0x314   :  { %1056 = vmatpush3.msra.mxu0 %v773_v35 }
 0x315   :  { %1057 = vmatprep.subr.mxu0 %v1134_v1 }
 0x316   :  { %1058 = vmatpush3.msra.mxu0 %v772_v36 }
 0x317   :  { %1059 = vmatprep.subr.mxu0 %v1134_v1 }
 0x318   :  { %1060 = vmatpush3.msra.mxu0 %v771_v37 }
 0x319   :  { %1061 = vmatprep.subr.mxu0 %v1134_v1 }
 0x31a   :  { %1062 = vmatpush3.msra.mxu0 %v770_v38 }
 0x31b   :  { %1063 = vmatprep.subr.mxu0 %v1134_v1  ;;  %v900_v1 = vld [vmem:[%s1528_s12] ss:$0 sm:$0xff] }
 0x31c   :  { %1064 = vmatpush3.msra.mxu0 %v769_v39 }
 0x3b9   :  { %v359_v55 = vpop.f32.mrf.mxu0 }
 0x3ba   :  { %v433_v57 = vadd.f32 %v432_v53, %v359_v55 }
 0x3bb   :  { %v984_v58 = vpop.f32.mrf.mxu0 }
 0x3bc   :  { %v443_v59 = vadd.f32 %v898_v56, %v433_v57  ;;  %v907_v56 = vld [vmem:[%s1535_s19] ss:$0 sm:$0xff]  ;;  %s1136_s19 = smov [#allocation2]  }
 0x3bd   :  { %v649_v60 = vpop.f32.mrf.mxu0  ;;  %s868_s25 = sshll.u32 %s1136_s19, 4  ;;  %s869_s25 = int_to_ptr.vmem [resolvable:$true] %s868_s25 }
 0x3be   :  { %v447_v61 = vsel %vm446_vm3, %v443_v59, 0.0  ;;  %s1090_s5 = scalar_lea.vmem %s869_s25, 128  ;;  %p1095_p1 = scmp.lt.s32.totalorder %s869_s25, %s869_s25 }
 0x3bf   :  { %448 = vadd.xlane.f32.xlu1 %v447_v61  ;;  %v1029_v62 = vpop.f32.mrf.mxu0  ;;  %p1091_p0 = scmp.ne.s32.totalorder %s869_s25, %s1090_s5  ;;  %p1096_p2 = scmp.lt.s32.totalorder %s1090_s5, %s1090_s5 }
 0x3c1   :  { %p1097_p3 = por %p1096_p2, %p1095_p1 }
 0x3c3   :  { %p1098_p4 = pnand %p1097_p3, %p1091_p0 }
 0x3c5   :  { %v719_v63 = vpop.f32.mrf.mxu0 }
 0x3c6   :  { %v720_v2 = vadd.f32 %v719_v63, %v649_v60 }
 0x3c7   :  { %v1040_v3 = vpop.f32.mrf.mxu0 }
 0x3c8   :  { %v730_v4 = vadd.f32 %v905_v0, %v720_v2 }
 0x3ca   :  { %v733_v5 = vsel %vm446_vm3, %v730_v4, 0.0 }
 0x3cb   :  { %734 = vadd.xlane.f32.xlu1 %v733_v5 }
 0x448   :  { %v449_v6 = vpop.xlane.xlu1 %448 }
 0x449   :  { %v451_v7 = vmul.f32 0.010416667, %v449_v6 }
 0x44b   :  { %v1382_v8 = vsub.f32 %v443_v59, %v451_v7 }
 0x44d   :  { %v453_v9 = vmul.f32 %v1382_v8, %v1382_v8 }
 0x44f   :  { %v454_v10 = vsel %vm446_vm3, %v453_v9, 0.0 }
 0x450   :  { %455 = vadd.xlane.f32.xlu0 %v454_v10 }
 0x454   :  { %v735_v11 = vpop.xlane.xlu1 %734 }
 0x455   :  { %v736_v12 = vmul.f32 0.010416667, %v735_v11 }
 0x457   :  { %v1387_v13 = vsub.f32 %v730_v4, %v736_v12  ;;  %v901_v12 = vld [vmem:[%s1530_s14] ss:$0 sm:$0xff] }
 0x459   :  { %v738_v14 = vmul.f32 %v1387_v13, %v1387_v13 }
 0x45b   :  { %v739_v15 = vsel %vm446_vm3, %v738_v14, 0.0 }
 0x45c   :  { %740 = vadd.xlane.f32.xlu1 %v739_v15 }
 0x4d9   :  { %v456_v40 = vpop.xlane.xlu0 %455 }
 0x4da   :  { %v457_v41 = vmul.f32 0.010416667, %v456_v40 }
 0x4dc   :  { %v458_v42 = vadd.f32 1e-05, %v457_v41 }
 0x4de   :  { %1078 = vrsqrt.f32 %v458_v42 }
 0x4e5   :  { %v741_v43 = vpop.xlane.xlu1 %740 }
 0x4e6   :  { %v742_v44 = vmul.f32 0.010416667, %v741_v43 }
 0x4e8   :  { %v743_v45 = vadd.f32 1e-05, %v742_v44 }
 0x4ea   :  { %1080 = vrsqrt.f32 %v743_v45 }
 0x4eb   :  { %v1079_v46 = vpop.eup %1078 }
 0x4ec   :  { %v460_v48 = vmul.f32 %v1079_v46, %v1382_v8 }
 0x4ee   :  { %v467_v49 = vmul.f32 %v899_v47, %v460_v48 }
 0x4f0   :  { %v474_v50 = vadd.f32 %v900_v1, %v467_v49 }
 0x4f2   :  { %v475_v51 = vmin.f32 %v474_v50, 20.0 }
 0x4f4   :  { %v476_v52 = vmul.f32 1.442695, %v475_v51 }
 0x4f6   :  { %1082 = vpow2.f32 %v476_v52 }
 0x4f7   :  { %v1081_v53 = vpop.eup %1080 }
 0x4f8   :  { %v745_v55 = vmul.f32 %v1081_v53, %v1387_v13 }
 0x4fa   :  { %v752_v57 = vmul.f32 %v906_v54, %v745_v55 }
 0x4fc   :  { %v759_v58 = vadd.f32 %v907_v56, %v752_v57 }
 0x4fe   :  { %v760_v59 = vmin.f32 %v759_v58, 20.0 }
 0x500   :  { %v761_v60 = vmul.f32 1.442695, %v760_v59 }
 0x502   :  { %1084 = vpow2.f32 %v761_v60 }
 0x503   :  { %v1083_v61 = vpop.eup %1082 }
 0x504   :  { %v478_v62 = vadd.f32 2.0, %v1083_v61 }
 0x506   :  { %v479_v63 = vmul.f32 %v1083_v61, %v478_v62 }
 0x508   :  { %v481_v0 = vadd.f32 2.0, %v479_v63  ;;  %v480_v6 = vmul.f32 %v479_v63, %v474_v50 }
 0x50a   :  { %1086 = vrcp.f32 %v481_v0 }
 0x50f   :  { %v1085_v2 = vpop.eup %1084 }
 0x510   :  { %v763_v3 = vadd.f32 2.0, %v1085_v2 }
 0x512   :  { %v764_v4 = vmul.f32 %v1085_v2, %v763_v3 }
 0x514   :  { %v766_v5 = vadd.f32 2.0, %v764_v4  ;;  %v765_v9 = vmul.f32 %v764_v4, %v759_v58 }
 0x516   :  { %1088 = vrcp.f32 %v766_v5 }
 0x517   :  { %v1087_v7 = vpop.eup %1086 }
 0x518   :  { %v483_v8 = vmul.f32 %v1087_v7, %v480_v6 }
 0x51a   :  { %1021 = vmatmul.mubr.msk.f32.vlgmr.msra.gmra.mxu1 %vm446_vm3, %v483_v8 }
 0x523   :  { %v1089_v10 = vpop.eup %1088 }
 0x524   :  { %v768_v11 = vmul.f32 %v1089_v10, %v765_v9 }
 0x526   :  { %1066 = vmatmul.mubr.msk.f32.vlgmr.msra.gmra.mxu0 %vm446_vm3, %v768_v11 }
 0x5da   :  { %v572_v13 = vpop.f32.mrf.mxu1 }
 0x5db   :  { %v573_v14 = vadd.f32 %v901_v12, %v572_v13 }
 0x5dc   :  { %v1022_v15 = vpop.f32.mrf.mxu1 }
 0x5dd   :  { %576 = vst.msk [vmem:[#allocation2] sm:$0xff] %vm86_vm1, %v573_v14 }
 0x5de   :  { %1101 = shalt.err (!%p1098_p4)
}
 0x5df   :  { %871 = dma.vmem_to_hbm [thread:$0]  %s869_s25, 128, %s1538_s22, [#allocation3]   ;;  %v908_v16 = vld [vmem:[%s1537_s21] ss:$0 sm:$0xff] }
 0x5e0   :  { %s1137_s2 = smov [#allocation4]  }
 0x5e1   :  { %s878_s6 = sshll.u32 %s1137_s2, 4  ;;  %s879_s6 = int_to_ptr.vmem [resolvable:$true] %s878_s6 }
 0x5e2   :  { %s1110_s27 = scalar_lea.vmem %s879_s6, 128  ;;  %p1115_p6 = scmp.lt.s32.totalorder %s879_s6, %s879_s6 }
 0x5e3   :  { %p1111_p5 = scmp.ne.s32.totalorder %s879_s6, %s1110_s27  ;;  %p1116_p7 = scmp.lt.s32.totalorder %s1110_s27, %s1110_s27 }
 0x5e5   :  { %p1117_p8 = por %p1116_p7, %p1115_p6 }
 0x5e6   :  { %v857_v17 = vpop.f32.mrf.mxu0 }
 0x5e7   :  { %v858_v18 = vadd.f32 %v908_v16, %v857_v17  ;;  %p1118_p9 = pnand %p1117_p8, %p1111_p5 }
 0x5e8   :  { %v1067_v19 = vpop.f32.mrf.mxu0 }
 0x5e9   :  { %861 = vst.msk [vmem:[#allocation4] sm:$0xff] %vm86_vm1, %v858_v18 }
 0x5ea   :  { %1121 = shalt.err (!%p1118_p9)
}
 0x5eb   :  { %881 = dma.vmem_to_hbm [thread:$0]  %s879_s6, 128, %s1539_s23, [#allocation5]  }
 0x5ec   :  { %1130 = dma.done.wait [#allocation3], 128  }
 0x5ed   :  { %1131 = vsyncadd [#allocation3], 4294967168 }
 0x5ee   :  { %1132 = dma.done.wait [#allocation5], 128  }
 0x5ef   :  { %1133 = vsyncadd [#allocation5], 4294967168 }
 0x5f0   :  { %888 = vsyncpa [#allocation3], 1 }
 0x5f1   :  { %889 = vsyncpa [#allocation5], 1 }

</bundles_post_ra>
